<compile_context>
chip_gen: v7x
topology: tpu7x:2x2x1
jax: 0.10.0
libtpu: 0.0.40
codegen_flags: <defaults>
</compile_context>

<pallas_src>
import jax
import jax.numpy as jnp
from jax import lax
from jax.experimental import pallas as pl
from jax.experimental.pallas import tpu as pltpu


def _noise_kernel(seed_ref, out_ref):
    """Counter-based uniform RNG: mix(global_index, seed) -> float32 in [0, 1)."""
    tile_r, sgs = out_ref.shape

    # Global element index of every element in this tile.
    row0 = pl.program_id(0) * tile_r
    rows = lax.broadcasted_iota(jnp.int32, (tile_r, sgs), 0) + row0
    cols = lax.broadcasted_iota(jnp.int32, (tile_r, sgs), 1)
    lin = rows * sgs + cols

    # 32-bit integer mix (lowbias32 / splitmix-style finalizer).
    x = lin.astype(jnp.uint32)
    seed_u = seed_ref[0].astype(jnp.uint32)
    x = x + seed_u * jnp.uint32(0x9E3779B9)
    x = x ^ (x >> jnp.uint32(16))
    x = x * jnp.uint32(0x7FEB352D)
    x = x ^ (x >> jnp.uint32(15))
    x = x * jnp.uint32(0x846CA68B)
    x = x ^ (x >> jnp.uint32(16))

    # 23 random bits -> float32 in [0, 1).  (int path: sitofp is universally
    # supported; value < 2^23 so the conversion is exact.)
    frac = (x & jnp.uint32(0x7FFFFF)).astype(jnp.int32).astype(jnp.float32)
    out_ref[...] = frac * jnp.float32(1.0 / (1 << 23))


def noise_generation(rand: int, system_group_size: int, seed: int = 0):
    """Equivalent of torch.rand(rand, system_group_size) on TPU via Pallas."""
    rand = int(rand)
    sgs = int(system_group_size)

    # Row-tile sizing: keep each output tile <= ~2 MiB (double-buffered ->
    # <= ~4 MiB VMEM), multiple of 8 rows, last dim kept full (lane-dense).
    bytes_per_row = max(sgs * 4, 1)
    cap_rows = max(8, ((2 * 1024 * 1024) // bytes_per_row) // 8 * 8)
    tile_r = rand if rand <= cap_rows else cap_rows
    grid = (pl.cdiv(rand, tile_r),)

    seed_arr = jnp.asarray([seed], dtype=jnp.int32)

    return pl.pallas_call(
        _noise_kernel,
        out_shape=jax.ShapeDtypeStruct((rand, sgs), jnp.float32),
        grid=grid,
        in_specs=[pl.BlockSpec(memory_space=pltpu.MemorySpace.SMEM)],
        out_specs=pl.BlockSpec((tile_r, sgs), lambda i: (i, 0)),
        compiler_params=pltpu.CompilerParams(
            dimension_semantics=("parallel",)),
        cost_estimate=pl.CostEstimate(
            flops=0, transcendentals=0, bytes_accessed=rand * sgs * 4),
    )(seed_arr)


if __name__ == "__main__":
    # Deterministic seed derived from PRNGKey(0).
    key = jax.random.PRNGKey(0)
    seed = int(jax.random.randint(key, (), 0, 2**31 - 1, dtype=jnp.int32))

    # Small shape consistent with the module's forward(): rand x system_group_size.
    rand_dim, system_group_size = 8, 128
    out = noise_generation(rand_dim, system_group_size, seed=seed)
    out = jax.block_until_ready(out)

    assert out.shape == (rand_dim, system_group_size), out.shape
    assert out.dtype == jnp.float32, out.dtype
    assert bool(jnp.all(out >= 0.0)) and bool(jnp.all(out < 1.0)), "values not in [0,1)"
    assert float(jnp.std(out)) > 0.05, "output suspiciously non-random"

    # Larger shape to exercise the tiled (multi-step grid) path.
    out2 = noise_generation(4096, 256, seed=seed + 1)
    out2 = jax.block_until_ready(out2)
    assert out2.shape == (4096, 256), out2.shape
    assert bool(jnp.all(out2 >= 0.0)) and bool(jnp.all(out2 < 1.0)), "values not in [0,1)"
    assert float(jnp.std(out2)) > 0.2, "output suspiciously non-random"
    # Different tiles must not repeat each other (parallel-safe per-element RNG).
    assert not bool(jnp.all(out2[:8] == out2[2048:2056])), "tiles identical"

    print("KERNEL_OK")
</pallas_src>

<mosaic_0001>
module attributes {stable_mosaic.version = 11 : i64} {
  func.func @_noise_kernel(%arg0: i32, %arg1: memref<1xi32, #tpu.memory_space<smem>>, %arg2: memref<8x128xf32, #tpu.memory_space<vmem>>) attributes {dimension_semantics = [#tpu.dimension_semantics<parallel>], iteration_bounds = array<i64: 1>, scalar_prefetch = 0 : i64, scratch_operands = 0 : i64, tpu.core_type = #tpu.core_type<tc>, window_params = [{transform_indices = @transform_0, window_bounds = array<i64: 1>}, {transform_indices = @transform_1, window_bounds = array<i64: 8, 128>}]} {
    %c8_i32 = arith.constant 8 : i32
    %0 = arith.muli %arg0, %c8_i32 : i32
    %1 = tpu.iota {dimensions = array<i32: 0>} : vector<8x128xi32>
    %2 = vector.broadcast %0 : i32 to vector<8x128xi32>
    %3 = arith.addi %1, %2 : vector<8x128xi32>
    %4 = tpu.iota {dimensions = array<i32: 1>} : vector<8x128xi32>
    %c128_i32 = arith.constant 128 : i32
    %5 = vector.broadcast %c128_i32 : i32 to vector<8x128xi32>
    %6 = arith.muli %3, %5 : vector<8x128xi32>
    %7 = arith.addi %6, %4 : vector<8x128xi32>
    %c0 = arith.constant 0 : index
    %8 = memref.load %arg1[%c0] : memref<1xi32, #tpu.memory_space<smem>>
    %c-1640531527_i32 = arith.constant -1640531527 : i32
    %9 = arith.muli %8, %c-1640531527_i32 : i32
    %10 = vector.broadcast %9 : i32 to vector<8x128xi32>
    %11 = arith.addi %7, %10 : vector<8x128xi32>
    %c16_i32 = arith.constant 16 : i32
    %12 = vector.broadcast %c16_i32 : i32 to vector<8x128xi32>
    %13 = arith.shrui %11, %12 : vector<8x128xi32>
    %14 = arith.xori %11, %13 : vector<8x128xi32>
    %c2146121005_i32 = arith.constant 2146121005 : i32
    %15 = vector.broadcast %c2146121005_i32 : i32 to vector<8x128xi32>
    %16 = arith.muli %14, %15 : vector<8x128xi32>
    %c15_i32 = arith.constant 15 : i32
    %17 = vector.broadcast %c15_i32 : i32 to vector<8x128xi32>
    %18 = arith.shrui %16, %17 : vector<8x128xi32>
    %19 = arith.xori %16, %18 : vector<8x128xi32>
    %c-2073254261_i32 = arith.constant -2073254261 : i32
    %20 = vector.broadcast %c-2073254261_i32 : i32 to vector<8x128xi32>
    %21 = arith.muli %19, %20 : vector<8x128xi32>
    %c16_i32_0 = arith.constant 16 : i32
    %22 = vector.broadcast %c16_i32_0 : i32 to vector<8x128xi32>
    %23 = arith.shrui %21, %22 : vector<8x128xi32>
    %24 = arith.xori %21, %23 : vector<8x128xi32>
    %c8388607_i32 = arith.constant 8388607 : i32
    %25 = vector.broadcast %c8388607_i32 : i32 to vector<8x128xi32>
    %26 = arith.andi %24, %25 : vector<8x128xi32>
    %27 = arith.sitofp %26 : vector<8x128xi32> to vector<8x128xf32>
    %cst = arith.constant 1.1920929E-7 : f32
    %28 = vector.broadcast %cst : f32 to vector<8x128xf32>
    %29 = arith.mulf %27, %28 : vector<8x128xf32>
    %c0_1 = arith.constant 0 : index
    %c0_2 = arith.constant 0 : index
    %30 = vector.load %arg2[%c0_1, %c0_2] : memref<8x128xf32, #tpu.memory_space<vmem>>, vector<8x128xf32>
    tpu.vector_store %arg2[%c0_1, %c0_2], %29 {strides = array<i32>} : memref<8x128xf32, #tpu.memory_space<vmem>>, vector<8x128xf32>,
    return
  }
  func.func @transform_0(%arg0: i32) -> i32 {
    %c0_i32 = arith.constant 0 : i32
    %c0_i32_0 = arith.constant 0 : i32
    return %c0_i32 : i32
  }
  func.func @transform_1(%arg0: i32) -> (i32, i32) {
    %c0_i32 = arith.constant 0 : i32
    %c0_i32_0 = arith.constant 0 : i32
    return %arg0, %c0_i32 : i32, i32
  }
}

</mosaic_0001>

<bundles_post_ra>
// kernel: tpu_custom_call.1
= control target key start
LH: loop header
LB: loop body
LE: loop exit
PB: predicated region body
PF: predicated region fallthrough
CT: control target
= control target key end

     0   :  { %v11_v0 = vlaneseq  ;;  %s100_s0 = inlined_call_operand.<no memory space> [shape: s32[1], index: 0, kind: input, shape index: {}]   ;;  %s101_s1 = inlined_call_operand.hbm [shape: f32[8,128], index: 1, kind: output, shape index: {}]  }
   0x1   :  { %7 = vsyncpa [#allocation4], 0  ;;  %s20_s8 = smul.u32 2654435769, %s100_s0  ;;  %s74_s9 = smov [#allocation3]  }
   0x2   :  { %v12_v1 = vshrl.u32 %v11_v0, 7  ;;  %v16_v2 = vand.u32 127, %v11_v0  ;;  %s41_s10 = sshll.u32 %s74_s9, 4  ;;  %s42_s10 = int_to_ptr.vmem [resolvable:$true] %s41_s10 }
   0x3   :  { %v21_v4 = vstv %s20_s8  ;;  %s50_s0 = scalar_lea.vmem %s42_s10, 128  ;;  %p55_p1 = scmp.lt.s32.totalorder %s42_s10, %s42_s10 }
   0x4   :  { %v17_v3 = vmul.u32 128, %v12_v1  ;;  %p51_p0 = scmp.ne.s32.totalorder %s42_s10, %s50_s0  ;;  %p56_p2 = scmp.lt.s32.totalorder %s50_s0, %s50_s0 }
   0x6   :  { %v18_v5 = vadd.s32 %v17_v3, %v16_v2  ;;  %p57_p3 = por %p56_p2, %p55_p1 }
   0x8   :  { %v22_v6 = vadd.s32 %v21_v4, %v18_v5  ;;  %p58_p4 = pnand %p57_p3, %p51_p0 }
   0xa   :  { %v23_v7 = vshrl.u32 %v22_v6, 16 }
   0xc   :  { %v24_v8 = vxor.u32 %v23_v7, %v22_v6 }
   0xe   :  { %v25_v9 = vmul.u32 2146121005, %v24_v8 }
  0x10   :  { %v26_v10 = vshrl.u32 %v25_v9, 15 }
  0x12   :  { %v27_v11 = vxor.u32 %v26_v10, %v25_v9 }
  0x14   :  { %v28_v12 = vmul.u32 2221713035, %v27_v11 }
  0x16   :  { %v29_v13 = vshrl.u32 %v28_v12, 16 }
  0x18   :  { %v30_v14 = vxor.u32 %v29_v13, %v28_v12 }
  0x1a   :  { %v31_v15 = vand.u32 8388607, %v30_v14 }
  0x1c   :  { %v32_v16 = vcvt.s32.f32 %v31_v15 }
  0x1e   :  { %v33_v17 = vmul.f32 1.1920929e-07, %v32_v16 }
  0x20   :  { %34 = vst [vmem:[#allocation3] sm:$0xff] %v33_v17 }
  0x21   :  { %61 = shalt.err (!%p58_p4)
}
  0x22   :  { %s62_s13 = scalar_lea.hbm %s101_s1, 128 }
  0x23   :  { %p63_p5 = scmp.ne.s32.totalorder %s101_s1, %s62_s13  ;;  %p66_p6 = scmp.lt.u32.totalorder %s62_s13, %s101_s1 }
  0x25   :  { %p68_p7 = pnand %p66_p6, %p63_p5 }
  0x27   :  { %71 = shalt.err (!%p68_p7)
}
  0x28   :  { %44 = dma.vmem_to_hbm [thread:$0]  %s42_s10, 128, %s101_s1, [#allocation4]  }
  0x29   :  { %72 = dma.done.wait [#allocation4], 128  }
  0x2a   :  { %73 = vsyncadd [#allocation4], 4294967168 }
  0x2b   :  { %48 = vsyncpa [#allocation4], 1 }

</bundles_post_ra>
